<compile_context>
chip_gen: v6e
topology: v6e:2x2x1
jax: 0.10.0
libtpu: 0.0.40
codegen_flags: <defaults>
</compile_context>

<pallas_src>
from functools import partial

import jax
import jax.numpy as jnp
from jax import lax
from jax.experimental import pallas as pl
from jax.experimental.pallas import tpu as pltpu

_VMEM_LIMIT = 32 * 1024 * 1024  # conservative scoped-VMEM budget (fits v5e/v6e/v7x)


def _pick_tile(dim, preferred):
    """Largest preferred tile that evenly divides `dim`, else the full dim."""
    for t in preferred:
        if dim >= t and dim % t == 0:
            return t
    return dim


# ---------------------------------------------------------------------------
# Tiled linear kernel:  y = x @ W^T   (W kept in nn.Linear layout (N, K))
# ---------------------------------------------------------------------------
def _linear_kernel(x_ref, w_ref, o_ref, acc_ref):
    @pl.when(pl.program_id(2) == 0)
    def _():
        acc_ref[...] = jnp.zeros_like(acc_ref)

    # NT contraction: (tm, tk) x (tn, tk) -> (tm, tn); MXU handles either
    # orientation, so no HBM-level weight transpose is needed.
    acc_ref[...] += lax.dot_general(
        x_ref[...], w_ref[...],
        dimension_numbers=(((1,), (1,)), ((), ())),
        preferred_element_type=jnp.float32)

    @pl.when(pl.program_id(2) == pl.num_programs(2) - 1)
    def _():
        o_ref[...] = acc_ref[...].astype(o_ref.dtype)


def pallas_linear(x, weight):
    """x: (M, K); weight: (N, K) as in torch.nn.Linear. Returns (M, N)."""
    M, K = x.shape
    N, K2 = weight.shape
    assert K == K2
    tm = _pick_tile(M, (256, 128))
    tn = _pick_tile(N, (256, 128))
    tk = _pick_tile(K, (512, 256, 128))
    grid = (M // tm, N // tn, K // tk)
    return pl.pallas_call(
        _linear_kernel,
        out_shape=jax.ShapeDtypeStruct((M, N), x.dtype),
        grid_spec=pltpu.PrefetchScalarGridSpec(
            num_scalar_prefetch=0,
            grid=grid,
            in_specs=[
                pl.BlockSpec((tm, tk), lambda i, j, k: (i, k)),
                pl.BlockSpec((tn, tk), lambda i, j, k: (j, k)),
            ],
            out_specs=pl.BlockSpec((tm, tn), lambda i, j, k: (i, j)),
            scratch_shapes=[pltpu.VMEM((tm, tn), jnp.float32)],
        ),
        compiler_params=pltpu.CompilerParams(
            dimension_semantics=("parallel", "parallel", "arbitrary"),
            vmem_limit_bytes=_VMEM_LIMIT),
    )(x, weight)


# ---------------------------------------------------------------------------
# RoPE kernel on token-major layout (B, S, NH*D); one grid point = one
# (batch, head, seq-tile).  Applied once per (kv-)head -> no GQA recompute.
# ---------------------------------------------------------------------------
def _rope_kernel(x_ref, cos_ref, sin_ref, o_ref):
    x = x_ref[0].astype(jnp.float32)      # (ts, D)
    c = cos_ref[0].astype(jnp.float32)    # (ts, D)
    s = sin_ref[0].astype(jnp.float32)    # (ts, D)
    half = x.shape[-1] // 2
    # rotate_half(x) == roll(x, D//2, last) * ([-1]*half ++ [+1]*half)
    sign = jnp.where(
        lax.broadcasted_iota(jnp.int32, x.shape, 1) < half, -1.0, 1.0)
    o_ref[0] = (x * c + pltpu.roll(x, half, axis=1) * sign * s).astype(o_ref.dtype)


def pallas_rope(x, cos, sin):
    """x: (B, S, NH*D); cos/sin: (B, S, D). Returns RoPE'd x, same layout."""
    B, S, ND = x.shape
    D = cos.shape[-1]
    NH = ND // D
    ts = _pick_tile(S, (512, 256, 128))
    grid = (B, NH, S // ts)
    return pl.pallas_call(
        _rope_kernel,
        out_shape=jax.ShapeDtypeStruct(x.shape, x.dtype),
        grid_spec=pltpu.PrefetchScalarGridSpec(
            num_scalar_prefetch=0,
            grid=grid,
            in_specs=[
                pl.BlockSpec((1, ts, D), lambda b, h, si: (b, si, h)),
                pl.BlockSpec((1, ts, D), lambda b, h, si: (b, si, 0)),
                pl.BlockSpec((1, ts, D), lambda b, h, si: (b, si, 0)),
            ],
            out_specs=pl.BlockSpec((1, ts, D), lambda b, h, si: (b, si, h)),
        ),
        compiler_params=pltpu.CompilerParams(
            dimension_semantics=("parallel", "parallel", "parallel"),
            vmem_limit_bytes=_VMEM_LIMIT),
    )(x, cos, sin)


# ---------------------------------------------------------------------------
# Flash-style causal attention on token-major layout.
#   q:   (B, Sq, H*D)      k, v: (B, Sk, KVH*D)      out: (B, Sq, H*D)
# grid = (B, H, q-tiles, kv-tiles); kv axis is the (innermost) reduction axis.
# ---------------------------------------------------------------------------
def _flash_kernel(q_ref, k_ref, v_ref, o_ref, m_sc, l_sc, acc_sc,
                  *, scale, chunk_start, tq, tkv):
    qi = pl.program_id(2)
    ki = pl.program_id(3)

    @pl.when(ki == 0)
    def _():
        m_sc[...] = jnp.full_like(m_sc, -1e30)
        l_sc[...] = jnp.zeros_like(l_sc)
        acc_sc[...] = jnp.zeros_like(acc_sc)

    q_start = chunk_start + qi * tq   # absolute position of query row 0
    k_start = ki * tkv                # absolute position of key row 0

    # Causal tile skip: this KV tile contributes only if its first key is not
    # strictly in the future of the last query of this Q tile.
    @pl.when(k_start <= q_start + (tq - 1))
    def _():
        q = q_ref[0].astype(jnp.bfloat16)      # (tq, D)
        k = k_ref[0].astype(jnp.bfloat16)      # (tkv, D)
        v = v_ref[0].astype(jnp.bfloat16)      # (tkv, D)

        s = lax.dot_general(                   # (tq, tkv), f32 accumulation
            q, k, dimension_numbers=(((1,), (1,)), ((), ())),
            preferred_element_type=jnp.float32) * scale

        qpos = lax.broadcasted_iota(jnp.int32, s.shape, 0) + q_start
        kpos = lax.broadcasted_iota(jnp.int32, s.shape, 1) + k_start
        valid = qpos >= kpos
        s = jnp.where(valid, s, -1e30)

        m_prev = m_sc[...]
        m_new = jnp.maximum(m_prev, jnp.max(s, axis=-1, keepdims=True))
        alpha = jnp.exp(m_prev - m_new)
        p = jnp.exp(s - m_new)
        p = jnp.where(valid, p, 0.0)           # rows fully above the diagonal add 0

        l_sc[...] = alpha * l_sc[...] + jnp.sum(p, axis=-1, keepdims=True)
        acc_sc[...] = alpha * acc_sc[...] + lax.dot_general(
            p.astype(jnp.bfloat16), v,
            dimension_numbers=(((1,), (0,)), ((), ())),
            preferred_element_type=jnp.float32)
        m_sc[...] = m_new

    @pl.when(ki == pl.num_programs(3) - 1)
    def _():
        inv = pl.reciprocal(l_sc[...], approx=True)
        o_ref[0] = (acc_sc[...] * inv).astype(o_ref.dtype)


def pallas_flash_attention(q, k, v, *, scale, chunk_start, num_kv_groups, head_dim):
    B, Sq, QD = q.shape
    _, Sk, _ = k.shape
    D = head_dim
    H = QD // D
    tq = _pick_tile(Sq, (256, 128))
    tkv = _pick_tile(Sk, (512, 256, 128))
    nq = Sq // tq
    nkv = Sk // tkv
    kernel = partial(_flash_kernel, scale=scale, chunk_start=chunk_start,
                     tq=tq, tkv=tkv)
    return pl.pallas_call(
        kernel,
        out_shape=jax.ShapeDtypeStruct((B, Sq, QD), q.dtype),
        grid_spec=pltpu.PrefetchScalarGridSpec(
            num_scalar_prefetch=0,
            grid=(B, H, nq, nkv),
            in_specs=[
                pl.BlockSpec((1, tq, D), lambda b, h, qi, ki: (b, qi, h)),
                # repeat_kv (GQA): query head h reads kv head h // groups
                pl.BlockSpec((1, tkv, D),
                             lambda b, h, qi, ki: (b, ki, h // num_kv_groups)),
                pl.BlockSpec((1, tkv, D),
                             lambda b, h, qi, ki: (b, ki, h // num_kv_groups)),
            ],
            out_specs=pl.BlockSpec((1, tq, D), lambda b, h, qi, ki: (b, qi, h)),
            scratch_shapes=[
                pltpu.VMEM((tq, 1), jnp.float32),   # running max
                pltpu.VMEM((tq, 1), jnp.float32),   # running sum
                pltpu.VMEM((tq, D), jnp.float32),   # output accumulator
            ],
        ),
        compiler_params=pltpu.CompilerParams(
            dimension_semantics=("parallel", "parallel", "parallel", "arbitrary"),
            vmem_limit_bytes=_VMEM_LIMIT),
    )(q, k, v)


# ---------------------------------------------------------------------------
# StreamAttention.forward wrapper (reshapes only; no HBM transposes)
# ---------------------------------------------------------------------------
def stream_attention_forward(hidden_states, position_embeddings, params,
                             chunk_range=None):
    B, q_len, hidden = hidden_states.shape
    cs, ce = (0, q_len) if chunk_range is None else chunk_range
    clen = ce - cs
    cos, sin = position_embeddings  # (B, S, head_dim)

    H = params["num_heads"]
    KVH = params["num_kv_heads"]
    D = params["head_dim"]
    scale = params["scaling"]
    groups = H // KVH

    # Fused q/k/v projection (single activation read).  Prefer a weight fused
    # once at load time; fall back to concatenating here.
    w_qkv = params.get("qkv_proj")
    if w_qkv is None:
        w_qkv = jnp.concatenate(
            [params["q_proj"], params["k_proj"], params["v_proj"]], axis=0)

    x = hidden_states[:, :ce, :].reshape(B * ce, hidden)
    qkv = pallas_linear(x, w_qkv).reshape(B, ce, (H + 2 * KVH) * D)
    q = qkv[:, cs:ce, : H * D]                      # (B, clen, H*D)
    k = qkv[:, :, H * D:(H + KVH) * D]              # (B, ce,  KVH*D)
    v = qkv[:, :, (H + KVH) * D:]                   # (B, ce,  KVH*D)

    # RoPE once per head / kv-head (no per-GQA-group recompute).
    q = pallas_rope(q, cos[:, cs:ce], sin[:, cs:ce])
    k = pallas_rope(k, cos[:, :ce], sin[:, :ce])

    attn = pallas_flash_attention(
        q, k, v, scale=scale, chunk_start=cs,
        num_kv_groups=groups, head_dim=D)           # (B, clen, H*D)

    out = pallas_linear(attn.reshape(B * clen, H * D), params["o_proj"])
    return out.reshape(B, clen, hidden)


# ---------------------------------------------------------------------------
# Pure-JAX reference (for verification) and helpers
# ---------------------------------------------------------------------------
def _rotate_half(x):
    x1, x2 = jnp.split(x, 2, axis=-1)
    return jnp.concatenate([-x2, x1], axis=-1)


def ref_forward(hidden_states, position_embeddings, params, chunk_range=None):
    B, q_len, hidden = hidden_states.shape
    cs, ce = (0, q_len) if chunk_range is None else chunk_range
    clen = ce - cs
    cos, sin = position_embeddings
    H, KVH, D = params["num_heads"], params["num_kv_heads"], params["head_dim"]
    scale = params["scaling"]

    q = hidden_states[:, cs:ce] @ params["q_proj"].T
    k = hidden_states[:, :ce] @ params["k_proj"].T
    v = hidden_states[:, :ce] @ params["v_proj"].T
    q = q.reshape(B, clen, H, D).transpose(0, 2, 1, 3)
    k = k.reshape(B, ce, KVH, D).transpose(0, 2, 1, 3)
    v = v.reshape(B, ce, KVH, D).transpose(0, 2, 1, 3)

    def rope(x, c, s):  # unsqueeze_dim=1
        return x * c[:, None] + _rotate_half(x) * s[:, None]

    q = rope(q, cos[:, cs:ce], sin[:, cs:ce])
    k = rope(k, cos[:, :ce], sin[:, :ce])

    g = H // KVH
    k = jnp.repeat(k, g, axis=1)
    v = jnp.repeat(v, g, axis=1)

    scores = jnp.einsum("bhqd,bhkd->bhqk", q, k) * scale
    qpos = jnp.arange(clen)[:, None] + cs
    kpos = jnp.arange(ce)[None, :]
    scores = jnp.where(qpos >= kpos, scores, -jnp.inf)
    p = jax.nn.softmax(scores, axis=-1)
    o = jnp.einsum("bhqk,bhkd->bhqd", p, v)
    o = o.transpose(0, 2, 1, 3).reshape(B, clen, H * D)
    return o @ params["o_proj"].T


def build_rope(B, seq_len, head_dim, theta=10000.0):
    inv_freq = 1.0 / (theta ** (jnp.arange(0, head_dim, 2, dtype=jnp.float32)
                                / head_dim))
    pos = jnp.arange(seq_len, dtype=jnp.float32)
    freqs = jnp.einsum("s,d->sd", pos, inv_freq)
    emb = jnp.concatenate([freqs, freqs], axis=-1)
    cos = jnp.broadcast_to(jnp.cos(emb)[None], (B, seq_len, head_dim))
    sin = jnp.broadcast_to(jnp.sin(emb)[None], (B, seq_len, head_dim))
    return cos, sin


if __name__ == "__main__":
    # Small, MXU/vreg-friendly config
    B, S = 2, 128
    HIDDEN = 256
    NUM_HEADS, NUM_KV_HEADS, HEAD_DIM = 2, 1, 128

    key = jax.random.PRNGKey(0)
    k0, k1, k2, k3, k4 = jax.random.split(key, 5)

    params = {
        "num_heads": NUM_HEADS,
        "num_kv_heads": NUM_KV_HEADS,
        "head_dim": HEAD_DIM,
        "scaling": HEAD_DIM ** -0.5,
        # nn.Linear weight layout: (out_features, in_features), bias=False (Gemma)
        "q_proj": 0.02 * jax.random.normal(k0, (NUM_HEADS * HEAD_DIM, HIDDEN), jnp.float32),
        "k_proj": 0.02 * jax.random.normal(k1, (NUM_KV_HEADS * HEAD_DIM, HIDDEN), jnp.float32),
        "v_proj": 0.02 * jax.random.normal(k2, (NUM_KV_HEADS * HEAD_DIM, HIDDEN), jnp.float32),
        "o_proj": 0.02 * jax.random.normal(k3, (HIDDEN, NUM_HEADS * HEAD_DIM), jnp.float32),
    }
    # Fuse q/k/v weights once at "load time" (outside the per-call path).
    params["qkv_proj"] = jnp.concatenate(
        [params["q_proj"], params["k_proj"], params["v_proj"]], axis=0)

    hidden_states = jax.random.normal(k4, (B, S, HIDDEN), jnp.float32)
    position_embeddings = build_rope(B, S, HEAD_DIM)

    # Full-sequence path (chunk_range=None)
    out = stream_attention_forward(hidden_states, position_embeddings, params,
                                   chunk_range=None)
    out = jax.block_until_ready(out)
    ref = ref_forward(hidden_states, position_embeddings, params, chunk_range=None)
    assert out.shape == (B, S, HIDDEN)
    assert bool(jnp.all(jnp.isfinite(out)))
    assert bool(jnp.allclose(out, ref, rtol=2e-2, atol=2e-2)), "mismatch vs reference"

    # Streamed-chunk path (chunk_start > 0)
    out_c = stream_attention_forward(hidden_states, position_embeddings, params,
                                     chunk_range=(64, 128))
    out_c = jax.block_until_ready(out_c)
    ref_c = ref_forward(hidden_states, position_embeddings, params,
                        chunk_range=(64, 128))
    assert out_c.shape == (B, 64, HIDDEN)
    assert bool(jnp.all(jnp.isfinite(out_c)))
    assert bool(jnp.allclose(out_c, ref_c, rtol=2e-2, atol=2e-2)), "chunk mismatch vs reference"

    print("KERNEL_OK")
</pallas_src>

<mosaic_0001>
module attributes {stable_mosaic.version = 11 : i64} {
  func.func @_linear_kernel(%arg0: i32, %arg1: i32, %arg2: i32, %arg3: memref<256x256xf32, #tpu.memory_space<vmem>>, %arg4: memref<256x256xf32, #tpu.memory_space<vmem>>, %arg5: memref<256x256xf32, #tpu.memory_space<vmem>>, %arg6: memref<256x256xf32, #tpu.memory_space<vmem>>) attributes {dimension_semantics = [#tpu.dimension_semantics<parallel>, #tpu.dimension_semantics<parallel>, #tpu.dimension_semantics<arbitrary>], iteration_bounds = array<i64: 1, 2, 1>, scalar_prefetch = 0 : i64, scratch_operands = 1 : i64, tpu.core_type = #tpu.core_type<tc>, window_params = [{transform_indices = @transform_0, window_bounds = array<i64: 256, 256>}, {transform_indices = @transform_1, window_bounds = array<i64: 256, 256>}, {transform_indices = @transform_2, window_bounds = array<i64: 256, 256>}]} {
    %c0_i32 = arith.constant 0 : i32
    %0 = arith.cmpi eq, %arg2, %c0_i32 : i32
    %1 = arith.extui %0 : i1 to i32
    %c0_i32_0 = arith.constant 0 : i32
    %2 = arith.cmpi ne, %1, %c0_i32_0 : i32
    scf.if %2 {
      %cst_10 = arith.constant 0.000000e+00 : f32
      %12 = vector.broadcast %cst_10 : f32 to vector<256x256xf32>
      %c0_11 = arith.constant 0 : index
      %c0_12 = arith.constant 0 : index
      %13 = vector.load %arg6[%c0_11, %c0_12] : memref<256x256xf32, #tpu.memory_space<vmem>>, vector<256x256xf32>
      tpu.vector_store %arg6[%c0_11, %c0_12], %12 {strides = array<i32>} : memref<256x256xf32, #tpu.memory_space<vmem>>, vector<256x256xf32>,
    } else {
    }
    %c0 = arith.constant 0 : index
    %c0_1 = arith.constant 0 : index
    %3 = vector.load %arg6[%c0, %c0_1] : memref<256x256xf32, #tpu.memory_space<vmem>>, vector<256x256xf32>
    %c0_2 = arith.constant 0 : index
    %c0_3 = arith.constant 0 : index
    %4 = vector.load %arg3[%c0_2, %c0_3] : memref<256x256xf32, #tpu.memory_space<vmem>>, vector<256x256xf32>
    %c0_4 = arith.constant 0 : index
    %c0_5 = arith.constant 0 : index
    %5 = vector.load %arg4[%c0_4, %c0_5] : memref<256x256xf32, #tpu.memory_space<vmem>>, vector<256x256xf32>
    %cst = arith.constant dense<0.000000e+00> : vector<256x256xf32>
    %6 = tpu.matmul %4, %5, %cst {dimension_numbers = #tpu.dot_dimension_numbers<[1], [1], [0], [0], [0, 0, 1, 0], [], []>} : vector<256x256xf32>, vector<256x256xf32>, vector<256x256xf32> -> vector<256x256xf32>
    %7 = arith.addf %3, %6 : vector<256x256xf32>
    %c0_6 = arith.constant 0 : index
    %c0_7 = arith.constant 0 : index
    %8 = vector.load %arg6[%c0_6, %c0_7] : memref<256x256xf32, #tpu.memory_space<vmem>>, vector<256x256xf32>
    tpu.vector_store %arg6[%c0_6, %c0_7], %7 {strides = array<i32>} : memref<256x256xf32, #tpu.memory_space<vmem>>, vector<256x256xf32>,
    %c0_i32_8 = arith.constant 0 : i32
    %9 = arith.cmpi eq, %arg2, %c0_i32_8 : i32
    %10 = arith.extui %9 : i1 to i32
    %c0_i32_9 = arith.constant 0 : i32
    %11 = arith.cmpi ne, %10, %c0_i32_9 : i32
    scf.if %11 {
      %c0_10 = arith.constant 0 : index
      %c0_11 = arith.constant 0 : index
      %12 = vector.load %arg6[%c0_10, %c0_11] : memref<256x256xf32, #tpu.memory_space<vmem>>, vector<256x256xf32>
      %c0_12 = arith.constant 0 : index
      %c0_13 = arith.constant 0 : index
      %13 = vector.load %arg5[%c0_12, %c0_13] : memref<256x256xf32, #tpu.memory_space<vmem>>, vector<256x256xf32>
      tpu.vector_store %arg5[%c0_12, %c0_13], %12 {strides = array<i32>} : memref<256x256xf32, #tpu.memory_space<vmem>>, vector<256x256xf32>,
    } else {
    }
    return
  }
  func.func @transform_0(%arg0: i32, %arg1: i32, %arg2: i32) -> (i32, i32) {
    %c0_i32 = arith.constant 0 : i32
    return %arg0, %arg2 : i32, i32
  }
  func.func @transform_1(%arg0: i32, %arg1: i32, %arg2: i32) -> (i32, i32) {
    %c0_i32 = arith.constant 0 : i32
    return %arg1, %arg2 : i32, i32
  }
  func.func @transform_2(%arg0: i32, %arg1: i32, %arg2: i32) -> (i32, i32) {
    %c0_i32 = arith.constant 0 : i32
    return %arg0, %arg1 : i32, i32
  }
}

</mosaic_0001>

<bundles_post_ra>
// kernel: tpu_custom_call.1
= control target key start
LH: loop header
LB: loop body
LE: loop exit
PB: predicated region body
PF: predicated region fallthrough
CT: control target
= control target key end

     0   :  { %7 = vsyncpa [#allocation4], 0  ;;  %s1772_s0 = inlined_call_operand.hbm [shape: f32[256,256], index: 0, kind: input, shape index: {}]   ;;  %s1773_s1 = inlined_call_operand.hbm [shape: f32[512,256], index: 1, kind: input, shape index: {}]   ;;  %s1774_s2 = inlined_call_operand.hbm [shape: f32[256,512], index: 2, kind: output, shape index: {}]  }
   0x1   :  { %8 = vsyncpa [#allocation7], 0 }
   0x2   :  { %10 = vsyncpa [#allocation7 + $0x1], 0 }
   0x3   :  { %11 = vsyncpa [#allocation5], 0 }
   0x4   :  { %13 = vsyncpa [#allocation5 + $0x1], 0  ;;  %s1448_s9 = smov 0   ;;  %s1450_s10 = smov 0  }
   0x5   :  { %s1452_s11 = smov 0   ;;  %s1454_s12 = smov 0  }
   0x6   :  { %s1456_s13 = smov 0   ;;  %s1458_s14 = smov 0  }
   0x7 LB: > { %s1122_s15 = sadd.s32 4294967295, %s1423_s14   ;;  %s1123_s16 = sadd.s32 4294967294, %s1423_s14   ;;  %s1423_s14 = sphi %s1458_s14, %s19_s14   ;;  %s1419_s13 = sphi %s1456_s13, %s1794_s13   ;;  %s1415_s12 = sphi %s1454_s12, %s1793_s12   ;;  %s1411_s11 = sphi %s1452_s11, %s1792_s11   ;;  %s1407_s10 = sphi %s1450_s10, %s1791_s10   ;;  %s1403_s9 = sphi %s1448_s9, %s1790_s9  }
   0x8   : > { %p88_p0 = scmp.ne.s32.totalorder %s1407_s10, %s1403_s9  ;;  %p1482_p1 = scmp.eq.s32.totalorder %s1122_s15, 0 }
   0x9   : > { %p1486_p2 = scmp.eq.s32.totalorder %s1122_s15, 1  ;;  %p120_p3 = scmp.eq.s32.totalorder %s1123_s16, 1 }
   0xa   : > { %p1492_p4 = por %p1482_p1, %p88_p0  ;;  %p1124_p5 = scmp.ge.s32.totalorder %s1423_s14, 1 }
   0xb   : > { %p1497_p6 = por %p120_p3, %p88_p0  ;;  %p127_p7 = scmp.lt.s32.totalorder %s1423_s14, 3 }
   0xc   : > { %s1779_s19 = scalar_select %p1492_p4, 1, 0 }
   0xd   : > { %s1780_s20 = scalar_select %p1497_p6, 1, 0 }
   0xe   : > { %p1502_p8 = pnand %p1124_p5, %p127_p7  ;;  %s1425_s22 = smov [#allocation3]  }
   0xf   : > { %s145_s23 = sshll.u32 %s1425_s22, 4  ;;  %s34_s25 = sadd.s32 1, %s1419_s13  ;;  %s146_s23 = int_to_ptr.vmem [resolvable:$true] %s145_s23 }
  0x10   : > { %p1215_p9 = pneg %p1502_p8  ;;  %s1296_s26 = scalar_lea.vmem %s146_s23, 8192 }
  0x11   : > { %p1297_p13 = scmp.ne.s32.totalorder %s146_s23, %s1296_s26  ;;  %p1304_p5 = scmp.lt.s32.totalorder %s146_s23, %s146_s23 }
  0x12   : > { %p1511_p11 = pnand %p1215_p9, %p1482_p1  ;;  %p1305_p7 = scmp.lt.s32.totalorder %s1296_s26, %s1296_s26 }
  0x14   : > { %p1287_p12 = pneg %p1511_p11  ;;  %p1306_p6 = por %p1305_p7, %p1304_p5 }
  0x16   : > { %p1299_p0 = pnand %p1297_p13, %p1287_p12 }
  0x18   : > { %p1300_p3 = pneg %p1299_p0 }
  0x1a   : > { %p1307_p4 = pnand %p1306_p6, %p1300_p3 }
  0x1c   : > { %1310 = shalt.err (!%p1307_p4)
}
  0x1d   : > { %s1776_s27 = smov 256   ;;  %s1427_s28 = smov 16  }
  0x1e   : > { %1218 = dma.hbm_to_vmem [thread:$0]  (!%p1511_p11), %s1772_s0, 8192, %s146_s23, [#allocation4], %s1776_s27, %s1776_s27, %s1427_s28  }
  0x1f   : > { %p36_p4 = scmp.ge.s32.totalorder %s34_s25, 2  ;;  %s75_s3 = sadd.s32 1, %s1411_s11 }
  0x20   : > { %p82_p6 = scmp.ne.s32.totalorder %s1411_s11, %s1407_s10  ;;  %p83_p9 = scmp.eq.s32.totalorder %s1423_s14, 0 }
  0x21   : > { %s1796_s25 = smov (%p36_p4, %s34_s25), 0  ;;  %p1228_p0 = scmp.lt.s32.totalorder %s1423_s14, 2 }
  0x22   : > { %p1532_p12 = por %p83_p9, %p82_p6  ;;  %p1538_p13 = por %p1486_p2, %p82_p6 }
  0x23   : > { %s70_s6 = ssub.s32 %s1419_s13, %s1796_s25  ;;  %s159_s7 = sand.u32 1, %s1411_s11  }
  0x24   : > { %p73_p11 = scmp.eq.s32.totalorder %s70_s6, 0  ;;  %s1127_s8 = sshll.u32 %s159_s7, 9 }
  0x25   : > { %s1141_s16 = sshll.u32 %s1419_s13, 13  ;;  %s163_s26 = scalar_lea.vmem [#allocation6], %s1127_s8 }
  0x26   : > { %s1547_s15 = scalar_select %p73_p11, %s1411_s11, %s75_s3  }
  0x27   : > { %s172_s24 = scalar_lea.hbm %s1773_s1, %s1141_s16  ;;  %s173_s29 = sshll.u32 %s163_s26, 4  ;;  %s174_s29 = int_to_ptr.vmem [resolvable:$true] %s173_s29 }
  0x28   : > { %p1555_p2 = pnand %p1228_p0, %p1532_p12  ;;  %s160_s30 = scalar_lea.sflag [#allocation7], %s159_s7 }
  0x29   : > { %s1324_s6 = scalar_lea.vmem %s174_s29, 8192  ;;  %s1428_s3 = smov [#allocation6]  }
  0x2a   : > { %p1313_p3 = pneg %p1555_p2  ;;  %p1325_p5 = scmp.ne.s32.totalorder %s174_s29, %s1324_s6 }
  0x2b   : > { %s1329_s27 = sshll.u32 %s1428_s3, 4  ;;  %s1330_s27 = int_to_ptr.vmem [resolvable:$false] %s1329_s27 }
  0x2c   : > { %p1327_p7 = pnand %p1325_p5, %p1313_p3  ;;  %s1331_s16 = scalar_lea.vmem %s1330_s27, 16384 }
  0x2d   : > { %p1332_p6 = scmp.lt.s32.totalorder %s174_s29, %s1330_s27  ;;  %p1333_p9 = scmp.lt.s32.totalorder %s1331_s16, %s1324_s6 }
  0x2e   : > { %p1328_p4 = pneg %p1327_p7 }
  0x2f   : > { %p1334_p11 = por %p1333_p9, %p1332_p6 }
  0x31   : > { %p1335_p10 = pnand %p1334_p11, %p1328_p4 }
  0x33   : > { %1338 = shalt.err (!%p1335_p10)
}
  0x34   : > { %s1786_s4 = smov 256   ;;  %185 = sbr.rel (%p1502_p8) target bundleno = 461 (0x1cd), region = 28 }
  0x35   : > { %1222 = dma.hbm_to_vmem [thread:$0]  (!%p1555_p2), %s172_s24, 8192, %s174_s29, %s160_s30, %s1786_s4, %s1786_s4, %s1427_s28  }
  0x39   : > { %1390 = dma.done.wait (%p1482_p1), [#allocation4], 8192  }
  0x3a   : > { %1392 = vsyncadd (%p1482_p1), [#allocation4], 4294959104  ;;  %s1573_s27 = sand.u32 1, %s1407_s10   ;;  %p1787_p10 = scmp.ne.s32.totalorder %s1779_s19, 0 }
  0x3b   : > { %s1133_s7 = sshll.u32 %s1573_s27, 9  ;;  %s192_s8 = scalar_lea.sflag [#allocation7], %s1573_s27 }
  0x3c   : > { %s1579_s28 = scalar_lea.vmem [#allocation6], %s1133_s7 }
  0x3d   : > { %1394 = dma.done.wait (%p1787_p10), %s192_s8, 8192  }
  0x3e   : > { %1396 = vsyncadd (%p1787_p10), %s192_s8, 4294959104  ;;  %v449_v0 = vld [vmem:[%s1579_s28 + $0xf8] sm:$0xff]  ;;  %v448_v1 = vld [vmem:[%s1579_s28 + $0xf0] sm:$0xff]  ;;  %s1651_s17 = scalar_lea.vmem [#allocation8], %s1133_s7  ;;  %s1142_s19 = sshll.u32 %s1415_s12, 8 }
  0x3f   : > { %v447_v2 = vld [vmem:[%s1579_s28 + $0xe8] sm:$0xff]  ;;  %482 = vmatprep.subr.mxu0 %v449_v0  ;;  %1143 = vmatprep.subr.mxu1 %v449_v0  ;;  %v446_v3 = vld [vmem:[%s1579_s28 + $0xe0] sm:$0xff]  ;;  %v445_v4 = vld [vmem:[%s1579_s28 + $0xd8] sm:$0xff]  ;;  %s1015_s21 = sshll.u32 %s1651_s17, 4  ;;  %s1718_s24 = scalar_lea.hbm %s1774_s2, %s1142_s19  ;;  %s1720_s21 = int_to_ptr.vmem [resolvable:$true] %s1015_s21 }
  0x40   : > { %483 = vmatpush1.xpose.msra.mxu0 %v448_v1  ;;  %1175 = vmatpush1.xpose.msra.mxu1 %v448_v1  ;;  %v444_v5 = vld [vmem:[%s1579_s28 + $0xd0] sm:$0xff]  ;;  %v443_v6 = vld [vmem:[%s1579_s28 + $0xc8] sm:$0xff]  ;;  %v442_v7 = vld [vmem:[%s1579_s28 + $0xc0] sm:$0xff]  ;;  %s999_s12 = scalar_lea.sflag [#allocation5], %s1573_s27  ;;  %s1339_s26 = scalar_lea.vmem %s1720_s21, 8192 }
  0x41   : > { %484 = vmatprep.subr.mxu0 %v447_v2  ;;  %1144 = vmatprep.subr.mxu1 %v447_v2  ;;  %v441_v8 = vld [vmem:[%s1579_s28 + $0xb8] sm:$0xff]  ;;  %v440_v9 = vld [vmem:[%s1579_s28 + $0xb0] sm:$0xff]  ;;  %v439_v10 = vld [vmem:[%s1579_s28 + $0xa8] sm:$0xff]  ;;  %p1340_p1 = scmp.ne.s32.totalorder %s1720_s21, %s1339_s26  ;;  %s1429_s29 = smov [#allocation8]  }
  0x42   : > { %v438_v11 = vld [vmem:[%s1579_s28 + $0xa0] sm:$0xff]  ;;  %v437_v12 = vld [vmem:[%s1579_s28 + $0x98] sm:$0xff]  ;;  %v355_v13 = vld [vmem:[#allocation3 + $0x8] sm:$0xff]  ;;  %s1343_s18 = sshll.u32 %s1429_s29, 4  ;;  %s1344_s18 = int_to_ptr.vmem [resolvable:$false] %s1343_s18 }
  0x43   : > { %v387_v14 = vld [vmem:[#allocation3 + $0x108] sm:$0xff]  ;;  %v436_v15 = vld [vmem:[%s1579_s28 + $0x90] sm:$0xff]  ;;  %546 = vmatprep.mubr.f32.mxu0 %v355_v13  ;;  %v434_v17 = vld [vmem:[%s1579_s28 + $0x80] sm:$0xff]  ;;  %p1341_p8 = pnand %p1340_p1, %p1538_p13  ;;  %s1345_s30 = scalar_lea.vmem %s1344_s18, 16384 }
  0x44   : > { %485 = vmatpush1.xpose.msra.mxu0 %v446_v3  ;;  %1176 = vmatpush1.xpose.msra.mxu1 %v446_v3  ;;  %v435_v16 = vld [vmem:[%s1579_s28 + $0x88] sm:$0xff]  ;;  %v433_v18 = vld [vmem:[%s1579_s28 + $0x78] sm:$0xff]  ;;  %v432_v19 = vld [vmem:[%s1579_s28 + $0x70] sm:$0xff]  ;;  %p1346_p0 = scmp.lt.s32.totalorder %s1720_s21, %s1344_s18  ;;  %p1347_p2 = scmp.lt.s32.totalorder %s1345_s30, %s1339_s26 }
  0x45   : > { %486 = vmatprep.subr.mxu0 %v445_v4  ;;  %1145 = vmatprep.subr.mxu1 %v445_v4  ;;  %v431_v20 = vld [vmem:[%s1579_s28 + $0x68] sm:$0xff]  ;;  %v430_v21 = vld [vmem:[%s1579_s28 + $0x60] sm:$0xff]  ;;  %v429_v22 = vld [vmem:[%s1579_s28 + $0x58] sm:$0xff]  ;;  %p1342_p12 = pneg %p1341_p8 }
  0x46   : > { %642 = vmatprep.mubr.f32.mxu1 %v387_v14  ;;  %v428_v23 = vld [vmem:[%s1579_s28 + $0x50] sm:$0xff]  ;;  %v427_v24 = vld [vmem:[%s1579_s28 + $0x48] sm:$0xff]  ;;  %v426_v25 = vld [vmem:[%s1579_s28 + $0x40] sm:$0xff]  ;;  %p1348_p3 = por %p1347_p2, %p1346_p0 }
  0x47   : > { %v425_v26 = vld [vmem:[%s1579_s28 + $0x38] sm:$0xff]  ;;  %v424_v27 = vld [vmem:[%s1579_s28 + $0x30] sm:$0xff]  ;;  %v423_v28 = vld [vmem:[%s1579_s28 + $0x28] sm:$0xff] }
  0x48   : > { %487 = vmatpush1.xpose.msra.mxu0 %v444_v5  ;;  %1177 = vmatpush1.xpose.msra.mxu1 %v444_v5  ;;  %v422_v29 = vld [vmem:[%s1579_s28 + $0x20] sm:$0xff]  ;;  %v421_v30 = vld [vmem:[%s1579_s28 + $0x18] sm:$0xff]  ;;  %v420_v31 = vld [vmem:[%s1579_s28 + $0x10] sm:$0xff]  ;;  %p1349_p5 = pnand %p1348_p3, %p1342_p12 }
  0x49   : > { %488 = vmatprep.subr.mxu0 %v443_v6  ;;  %1146 = vmatprep.subr.mxu1 %v443_v6  ;;  %v419_v32 = vld [vmem:[%s1579_s28 + $0x8] sm:$0xff]  ;;  %v418_v33 = vld [vmem:[%s1579_s28] sm:$0xff]  ;;  %v481_v34 = vld [vmem:[%s1579_s28 + $0x1f8] sm:$0xff] }
  0x4a   : > { %v480_v35 = vld [vmem:[%s1579_s28 + $0x1f0] sm:$0xff]  ;;  %v479_v36 = vld [vmem:[%s1579_s28 + $0x1e8] sm:$0xff]  ;;  %v478_v37 = vld [vmem:[%s1579_s28 + $0x1e0] sm:$0xff] }
  0x4b   : > { %v477_v38 = vld [vmem:[%s1579_s28 + $0x1d8] sm:$0xff]  ;;  %v476_v39 = vld [vmem:[%s1579_s28 + $0x1d0] sm:$0xff]  ;;  %v475_v40 = vld [vmem:[%s1579_s28 + $0x1c8] sm:$0xff] }
  0x4c   : > { %489 = vmatpush1.xpose.msra.mxu0 %v442_v7  ;;  %1178 = vmatpush1.xpose.msra.mxu1 %v442_v7  ;;  %v474_v41 = vld [vmem:[%s1579_s28 + $0x1c0] sm:$0xff]  ;;  %v473_v42 = vld [vmem:[%s1579_s28 + $0x1b8] sm:$0xff]  ;;  %v472_v43 = vld [vmem:[%s1579_s28 + $0x1b0] sm:$0xff] }
  0x4d   : > { %490 = vmatprep.subr.mxu0 %v441_v8  ;;  %1147 = vmatprep.subr.mxu1 %v441_v8  ;;  %v471_v44 = vld [vmem:[%s1579_s28 + $0x1a8] sm:$0xff]  ;;  %v470_v45 = vld [vmem:[%s1579_s28 + $0x1a0] sm:$0xff]  ;;  %v469_v46 = vld [vmem:[%s1579_s28 + $0x198] sm:$0xff] }
  0x4e   : > { %v468_v47 = vld [vmem:[%s1579_s28 + $0x190] sm:$0xff]  ;;  %v467_v48 = vld [vmem:[%s1579_s28 + $0x188] sm:$0xff]  ;;  %v466_v49 = vld [vmem:[%s1579_s28 + $0x180] sm:$0xff] }
  0x4f   : > { %v465_v50 = vld [vmem:[%s1579_s28 + $0x178] sm:$0xff]  ;;  %v464_v51 = vld [vmem:[%s1579_s28 + $0x170] sm:$0xff]  ;;  %v463_v52 = vld [vmem:[%s1579_s28 + $0x168] sm:$0xff] }
  0x50   : > { %491 = vmatpush1.xpose.msra.mxu0 %v440_v9  ;;  %1179 = vmatpush1.xpose.msra.mxu1 %v440_v9  ;;  %v462_v53 = vld [vmem:[%s1579_s28 + $0x160] sm:$0xff]  ;;  %v461_v54 = vld [vmem:[%s1579_s28 + $0x158] sm:$0xff]  ;;  %v460_v55 = vld [vmem:[%s1579_s28 + $0x150] sm:$0xff] }
  0x51   : > { %492 = vmatprep.subr.mxu0 %v439_v10  ;;  %1148 = vmatprep.subr.mxu1 %v439_v10  ;;  %v459_v56 = vld [vmem:[%s1579_s28 + $0x148] sm:$0xff]  ;;  %v458_v57 = vld [vmem:[%s1579_s28 + $0x140] sm:$0xff]  ;;  %v457_v58 = vld [vmem:[%s1579_s28 + $0x138] sm:$0xff] }
  0x52   : > { %v456_v59 = vld [vmem:[%s1579_s28 + $0x130] sm:$0xff]  ;;  %v455_v60 = vld [vmem:[%s1579_s28 + $0x128] sm:$0xff]  ;;  %v454_v61 = vld [vmem:[%s1579_s28 + $0x120] sm:$0xff] }
  0x53   : > { %v453_v62 = vld [vmem:[%s1579_s28 + $0x118] sm:$0xff]  ;;  %v452_v63 = vld [vmem:[%s1579_s28 + $0x110] sm:$0xff]  ;;  %v451_v0 = vld [vmem:[%s1579_s28 + $0x108] sm:$0xff] }
  0x54   : > { %493 = vmatpush1.xpose.msra.mxu0 %v438_v11  ;;  %1180 = vmatpush1.xpose.msra.mxu1 %v438_v11  ;;  %v450_v1 = vld [vmem:[%s1579_s28 + $0x100] sm:$0xff]  ;;  %v357_v4 = vld [vmem:[#allocation3 + $0x18] sm:$0xff]  ;;  %v356_v6 = vld [vmem:[#allocation3 + $0x10] sm:$0xff] }
  0x55   : > { %494 = vmatprep.subr.mxu0 %v437_v12  ;;  %1149 = vmatprep.subr.mxu1 %v437_v12  ;;  %v354_v2 = vld [vmem:[#allocation3] sm:$0xff]  ;;  %v389_v5 = vld [vmem:[#allocation3 + $0x118] sm:$0xff]  ;;  %v388_v7 = vld [vmem:[#allocation3 + $0x110] sm:$0xff] }
  0x56   : > { %v386_v3 = vld [vmem:[#allocation3 + $0x100] sm:$0xff]  ;;  %v359_v8 = vld [vmem:[#allocation3 + $0x28] sm:$0xff]  ;;  %v361_v12 = vld [vmem:[#allocation3 + $0x38] sm:$0xff] }
  0x57   : > { %v391_v9 = vld [vmem:[#allocation3 + $0x128] sm:$0xff]  ;;  %v358_v10 = vld [vmem:[#allocation3 + $0x20] sm:$0xff]  ;;  %v393_v13 = vld [vmem:[#allocation3 + $0x138] sm:$0xff] }
  0x58   : > { %495 = vmatpush1.xpose.msra.mxu0 %v436_v15  ;;  %1181 = vmatpush1.xpose.msra.mxu1 %v436_v15  ;;  %v390_v11 = vld [vmem:[#allocation3 + $0x120] sm:$0xff]  ;;  %v360_v14 = vld [vmem:[#allocation3 + $0x30] sm:$0xff] }
  0x59   : > { %496 = vmatprep.subr.mxu0 %v435_v16  ;;  %1150 = vmatprep.subr.mxu1 %v435_v16  ;;  %v392_v15 = vld [vmem:[#allocation3 + $0x130] sm:$0xff]  ;;  %v363_v16 = vld [vmem:[#allocation3 + $0x48] sm:$0xff] }
  0x5c   : > { %497 = vmatpush1.xpose.msra.mxu0 %v434_v17  ;;  %1182 = vmatpush1.xpose.msra.mxu1 %v434_v17  ;;  %v395_v17 = vld [vmem:[#allocation3 + $0x148] sm:$0xff] }
  0x5d   : > { %498 = vmatprep.subr.mxu0 %v433_v18  ;;  %1151 = vmatprep.subr.mxu1 %v433_v18  ;;  %v362_v18 = vld [vmem:[#allocation3 + $0x40] sm:$0xff] }
  0x60   : > { %499 = vmatpush1.xpose.msra.mxu0 %v432_v19  ;;  %1183 = vmatpush1.xpose.msra.mxu1 %v432_v19  ;;  %v394_v19 = vld [vmem:[#allocation3 + $0x140] sm:$0xff] }
  0x61   : > { %500 = vmatprep.subr.mxu0 %v431_v20  ;;  %1152 = vmatprep.subr.mxu1 %v431_v20  ;;  %v365_v20 = vld [vmem:[#allocation3 + $0x58] sm:$0xff] }
  0x64   : > { %501 = vmatpush1.xpose.msra.mxu0 %v430_v21  ;;  %1184 = vmatpush1.xpose.msra.mxu1 %v430_v21  ;;  %v397_v21 = vld [vmem:[#allocation3 + $0x158] sm:$0xff] }
  0x65   : > { %502 = vmatprep.subr.mxu0 %v429_v22  ;;  %1153 = vmatprep.subr.mxu1 %v429_v22  ;;  %v364_v22 = vld [vmem:[#allocation3 + $0x50] sm:$0xff] }
  0x68   : > { %503 = vmatpush1.xpose.msra.mxu0 %v428_v23  ;;  %1185 = vmatpush1.xpose.msra.mxu1 %v428_v23  ;;  %v396_v23 = vld [vmem:[#allocation3 + $0x150] sm:$0xff] }
  0x69   : > { %504 = vmatprep.subr.mxu0 %v427_v24  ;;  %1154 = vmatprep.subr.mxu1 %v427_v24  ;;  %v367_v24 = vld [vmem:[#allocation3 + $0x68] sm:$0xff] }
  0x6c   : > { %505 = vmatpush1.xpose.msra.mxu0 %v426_v25  ;;  %1186 = vmatpush1.xpose.msra.mxu1 %v426_v25  ;;  %v399_v25 = vld [vmem:[#allocation3 + $0x168] sm:$0xff] }
  0x6d   : > { %506 = vmatprep.subr.mxu0 %v425_v26  ;;  %1155 = vmatprep.subr.mxu1 %v425_v26  ;;  %v366_v26 = vld [vmem:[#allocation3 + $0x60] sm:$0xff] }
  0x70   : > { %507 = vmatpush1.xpose.msra.mxu0 %v424_v27  ;;  %1187 = vmatpush1.xpose.msra.mxu1 %v424_v27  ;;  %v398_v27 = vld [vmem:[#allocation3 + $0x160] sm:$0xff] }
  0x71   : > { %508 = vmatprep.subr.mxu0 %v423_v28  ;;  %1156 = vmatprep.subr.mxu1 %v423_v28  ;;  %v369_v28 = vld [vmem:[#allocation3 + $0x78] sm:$0xff] }
  0x74   : > { %509 = vmatpush1.xpose.msra.mxu0 %v422_v29  ;;  %1188 = vmatpush1.xpose.msra.mxu1 %v422_v29  ;;  %v401_v29 = vld [vmem:[#allocation3 + $0x178] sm:$0xff] }
  0x75   : > { %510 = vmatprep.subr.mxu0 %v421_v30  ;;  %1157 = vmatprep.subr.mxu1 %v421_v30  ;;  %v368_v30 = vld [vmem:[#allocation3 + $0x70] sm:$0xff] }
  0x78   : > { %511 = vmatpush1.xpose.msra.mxu0 %v420_v31  ;;  %1189 = vmatpush1.xpose.msra.mxu1 %v420_v31  ;;  %v400_v31 = vld [vmem:[#allocation3 + $0x170] sm:$0xff] }
  0x79   : > { %512 = vmatprep.subr.mxu0 %v419_v32  ;;  %1158 = vmatprep.subr.mxu1 %v419_v32  ;;  %v371_v32 = vld [vmem:[#allocation3 + $0x88] sm:$0xff] }
  0x7c   : > { %513 = vmatpush1.xpose.msra.mxu0 %v418_v33  ;;  %1190 = vmatpush1.xpose.msra.mxu1 %v418_v33  ;;  %v403_v33 = vld [vmem:[#allocation3 + $0x188] sm:$0xff] }
  0x7d   : > { %514 = vmatprep.subr.mxu0 %v481_v34  ;;  %1159 = vmatprep.subr.mxu1 %v481_v34  ;;  %v370_v34 = vld [vmem:[#allocation3 + $0x80] sm:$0xff] }
  0x80   : > { %515 = vmatpush2.xpose.msra.mxu0 %v480_v35  ;;  %1191 = vmatpush2.xpose.msra.mxu1 %v480_v35  ;;  %v402_v35 = vld [vmem:[#allocation3 + $0x180] sm:$0xff] }
  0x81   : > { %516 = vmatprep.subr.mxu0 %v479_v36  ;;  %1160 = vmatprep.subr.mxu1 %v479_v36  ;;  %v373_v36 = vld [vmem:[#allocation3 + $0x98] sm:$0xff] }
  0x84   : > { %517 = vmatpush2.xpose.msra.mxu0 %v478_v37  ;;  %1192 = vmatpush2.xpose.msra.mxu1 %v478_v37  ;;  %v405_v37 = vld [vmem:[#allocation3 + $0x198] sm:$0xff] }
  0x85   : > { %518 = vmatprep.subr.mxu0 %v477_v38  ;;  %1161 = vmatprep.subr.mxu1 %v477_v38  ;;  %v372_v38 = vld [vmem:[#allocation3 + $0x90] sm:$0xff] }
  0x88   : > { %519 = vmatpush2.xpose.msra.mxu0 %v476_v39  ;;  %1193 = vmatpush2.xpose.msra.mxu1 %v476_v39  ;;  %v404_v39 = vld [vmem:[#allocation3 + $0x190] sm:$0xff] }
  0x89   : > { %520 = vmatprep.subr.mxu0 %v475_v40  ;;  %1162 = vmatprep.subr.mxu1 %v475_v40  ;;  %v375_v40 = vld [vmem:[#allocation3 + $0xa8] sm:$0xff] }
  0x8c   : > { %521 = vmatpush2.xpose.msra.mxu0 %v474_v41  ;;  %1194 = vmatpush2.xpose.msra.mxu1 %v474_v41  ;;  %v407_v41 = vld [vmem:[#allocation3 + $0x1a8] sm:$0xff] }
  0x8d   : > { %522 = vmatprep.subr.mxu0 %v473_v42  ;;  %1163 = vmatprep.subr.mxu1 %v473_v42  ;;  %v374_v42 = vld [vmem:[#allocation3 + $0xa0] sm:$0xff] }
  0x90   : > { %523 = vmatpush2.xpose.msra.mxu0 %v472_v43  ;;  %1195 = vmatpush2.xpose.msra.mxu1 %v472_v43  ;;  %v406_v43 = vld [vmem:[#allocation3 + $0x1a0] sm:$0xff] }
  0x91   : > { %524 = vmatprep.subr.mxu0 %v471_v44  ;;  %1164 = vmatprep.subr.mxu1 %v471_v44  ;;  %v377_v44 = vld [vmem:[#allocation3 + $0xb8] sm:$0xff] }
  0x94   : > { %525 = vmatpush2.xpose.msra.mxu0 %v470_v45  ;;  %1196 = vmatpush2.xpose.msra.mxu1 %v470_v45  ;;  %v409_v45 = vld [vmem:[#allocation3 + $0x1b8] sm:$0xff] }
  0x95   : > { %526 = vmatprep.subr.mxu0 %v469_v46  ;;  %1165 = vmatprep.subr.mxu1 %v469_v46  ;;  %v376_v46 = vld [vmem:[#allocation3 + $0xb0] sm:$0xff] }
  0x98   : > { %527 = vmatpush2.xpose.msra.mxu0 %v468_v47  ;;  %1197 = vmatpush2.xpose.msra.mxu1 %v468_v47  ;;  %v408_v47 = vld [vmem:[#allocation3 + $0x1b0] sm:$0xff] }
  0x99   : > { %528 = vmatprep.subr.mxu0 %v467_v48  ;;  %1166 = vmatprep.subr.mxu1 %v467_v48  ;;  %v379_v48 = vld [vmem:[#allocation3 + $0xc8] sm:$0xff] }
  0x9c   : > { %529 = vmatpush2.xpose.msra.mxu0 %v466_v49  ;;  %1198 = vmatpush2.xpose.msra.mxu1 %v466_v49  ;;  %v411_v49 = vld [vmem:[#allocation3 + $0x1c8] sm:$0xff] }
  0x9d   : > { %530 = vmatprep.subr.mxu0 %v465_v50  ;;  %1167 = vmatprep.subr.mxu1 %v465_v50  ;;  %v378_v50 = vld [vmem:[#allocation3 + $0xc0] sm:$0xff] }
  0xa0   : > { %531 = vmatpush2.xpose.msra.mxu0 %v464_v51  ;;  %1199 = vmatpush2.xpose.msra.mxu1 %v464_v51  ;;  %v410_v51 = vld [vmem:[#allocation3 + $0x1c0] sm:$0xff] }
  0xa1   : > { %532 = vmatprep.subr.mxu0 %v463_v52  ;;  %1168 = vmatprep.subr.mxu1 %v463_v52  ;;  %v381_v52 = vld [vmem:[#allocation3 + $0xd8] sm:$0xff] }
  0xa4   : > { %533 = vmatpush2.xpose.msra.mxu0 %v462_v53  ;;  %1200 = vmatpush2.xpose.msra.mxu1 %v462_v53  ;;  %v413_v53 = vld [vmem:[#allocation3 + $0x1d8] sm:$0xff] }
  0xa5   : > { %534 = vmatprep.subr.mxu0 %v461_v54  ;;  %1169 = vmatprep.subr.mxu1 %v461_v54  ;;  %v380_v54 = vld [vmem:[#allocation3 + $0xd0] sm:$0xff] }
  0xa8   : > { %535 = vmatpush2.xpose.msra.mxu0 %v460_v55  ;;  %1201 = vmatpush2.xpose.msra.mxu1 %v460_v55  ;;  %v412_v55 = vld [vmem:[#allocation3 + $0x1d0] sm:$0xff] }
  0xa9   : > { %536 = vmatprep.subr.mxu0 %v459_v56  ;;  %1170 = vmatprep.subr.mxu1 %v459_v56  ;;  %v383_v56 = vld [vmem:[#allocation3 + $0xe8] sm:$0xff] }
  0xac   : > { %537 = vmatpush2.xpose.msra.mxu0 %v458_v57  ;;  %1202 = vmatpush2.xpose.msra.mxu1 %v458_v57  ;;  %v415_v57 = vld [vmem:[#allocation3 + $0x1e8] sm:$0xff] }
  0xad   : > { %538 = vmatprep.subr.mxu0 %v457_v58  ;;  %1171 = vmatprep.subr.mxu1 %v457_v58  ;;  %v382_v58 = vld [vmem:[#allocation3 + $0xe0] sm:$0xff] }
  0xb0   : > { %539 = vmatpush2.xpose.msra.mxu0 %v456_v59  ;;  %1203 = vmatpush2.xpose.msra.mxu1 %v456_v59  ;;  %v414_v59 = vld [vmem:[#allocation3 + $0x1e0] sm:$0xff] }
  0xb1   : > { %540 = vmatprep.subr.mxu0 %v455_v60  ;;  %1172 = vmatprep.subr.mxu1 %v455_v60  ;;  %v385_v60 = vld [vmem:[#allocation3 + $0xf8] sm:$0xff] }
  0xb4   : > { %541 = vmatpush2.xpose.msra.mxu0 %v454_v61  ;;  %1204 = vmatpush2.xpose.msra.mxu1 %v454_v61  ;;  %v417_v61 = vld [vmem:[#allocation3 + $0x1f8] sm:$0xff] }
  0xb5   : > { %542 = vmatprep.subr.mxu0 %v453_v62  ;;  %1173 = vmatprep.subr.mxu1 %v453_v62  ;;  %v384_v62 = vld [vmem:[#allocation3 + $0xf0] sm:$0xff] }
  0xb8   : > { %543 = vmatpush2.xpose.msra.mxu0 %v452_v63  ;;  %1205 = vmatpush2.xpose.msra.mxu1 %v452_v63  ;;  %v416_v63 = vld [vmem:[#allocation3 + $0x1f0] sm:$0xff] }
  0xb9   : > { %544 = vmatprep.subr.mxu0 %v451_v0  ;;  %1174 = vmatprep.subr.mxu1 %v451_v0 }
  0xbc   : > { %545 = vmatpush2.xpose.msra.mxu0 %v450_v1  ;;  %1206 = vmatpush2.xpose.msra.mxu1 %v450_v1 }
  0xbf   : > { %547 = vmatmul.mubr.f32.vlgmr.msra.gmra.mxu0 %v354_v2  ;;  %643 = vmatmul.mubr.f32.vlgmr.msra.gmra.mxu1 %v386_v3 }
  0xc0   : > { %552 = vmatprep.mubr.f32.mxu0 %v357_v4  ;;  %648 = vmatprep.mubr.f32.mxu1 %v389_v5 }
  0xc3   : > { %553 = vmatmul.mubr.f32.gmra.mxu0 %v356_v6  ;;  %649 = vmatmul.mubr.f32.gmra.mxu1 %v388_v7 }
  0xc4   : > { %558 = vmatprep.mubr.f32.mxu0 %v359_v8  ;;  %654 = vmatprep.mubr.f32.mxu1 %v391_v9 }
  0xc7   : > { %559 = vmatmul.mubr.f32.gmra.mxu0 %v358_v10  ;;  %655 = vmatmul.mubr.f32.gmra.mxu1 %v390_v11 }
  0xc8   : > { %564 = vmatprep.mubr.f32.mxu0 %v361_v12  ;;  %660 = vmatprep.mubr.f32.mxu1 %v393_v13 }
  0xcb   : > { %565 = vmatmul.mubr.f32.gmra.mxu0 %v360_v14  ;;  %661 = vmatmul.mubr.f32.gmra.mxu1 %v392_v15 }
  0xcc   : > { %570 = vmatprep.mubr.f32.mxu0 %v363_v16  ;;  %666 = vmatprep.mubr.f32.mxu1 %v395_v17 }
  0xcf   : > { %571 = vmatmul.mubr.f32.gmra.mxu0 %v362_v18  ;;  %667 = vmatmul.mubr.f32.gmra.mxu1 %v394_v19 }
  0xd0   : > { %576 = vmatprep.mubr.f32.mxu0 %v365_v20  ;;  %672 = vmatprep.mubr.f32.mxu1 %v397_v21 }
  0xd3   : > { %577 = vmatmul.mubr.f32.gmra.mxu0 %v364_v22  ;;  %673 = vmatmul.mubr.f32.gmra.mxu1 %v396_v23 }
  0xd4   : > { %582 = vmatprep.mubr.f32.mxu0 %v367_v24  ;;  %678 = vmatprep.mubr.f32.mxu1 %v399_v25 }
  0xd7   : > { %583 = vmatmul.mubr.f32.gmra.mxu0 %v366_v26  ;;  %679 = vmatmul.mubr.f32.gmra.mxu1 %v398_v27 }
  0xd8   : > { %588 = vmatprep.mubr.f32.mxu0 %v369_v28  ;;  %684 = vmatprep.mubr.f32.mxu1 %v401_v29 }
  0xdb   : > { %589 = vmatmul.mubr.f32.gmra.mxu0 %v368_v30  ;;  %685 = vmatmul.mubr.f32.gmra.mxu1 %v400_v31 }
  0xdc   : > { %594 = vmatprep.mubr.f32.mxu0 %v371_v32  ;;  %690 = vmatprep.mubr.f32.mxu1 %v403_v33 }
  0xdf   : > { %595 = vmatmul.mubr.f32.gmra.mxu0 %v370_v34  ;;  %691 = vmatmul.mubr.f32.gmra.mxu1 %v402_v35 }
  0xe0   : > { %600 = vmatprep.mubr.f32.mxu0 %v373_v36  ;;  %696 = vmatprep.mubr.f32.mxu1 %v405_v37 }
  0xe3   : > { %601 = vmatmul.mubr.f32.gmra.mxu0 %v372_v38  ;;  %697 = vmatmul.mubr.f32.gmra.mxu1 %v404_v39 }
  0xe4   : > { %606 = vmatprep.mubr.f32.mxu0 %v375_v40  ;;  %702 = vmatprep.mubr.f32.mxu1 %v407_v41 }
  0xe7   : > { %607 = vmatmul.mubr.f32.gmra.mxu0 %v374_v42  ;;  %703 = vmatmul.mubr.f32.gmra.mxu1 %v406_v43 }
  0xe8   : > { %612 = vmatprep.mubr.f32.mxu0 %v377_v44  ;;  %708 = vmatprep.mubr.f32.mxu1 %v409_v45 }
  0xeb   : > { %613 = vmatmul.mubr.f32.gmra.mxu0 %v376_v46  ;;  %709 = vmatmul.mubr.f32.gmra.mxu1 %v408_v47 }
  0xec   : > { %618 = vmatprep.mubr.f32.mxu0 %v379_v48  ;;  %714 = vmatprep.mubr.f32.mxu1 %v411_v49 }
  0xef   : > { %619 = vmatmul.mubr.f32.gmra.mxu0 %v378_v50  ;;  %715 = vmatmul.mubr.f32.gmra.mxu1 %v410_v51 }
  0xf0   : > { %624 = vmatprep.mubr.f32.mxu0 %v381_v52  ;;  %720 = vmatprep.mubr.f32.mxu1 %v413_v53 }
  0xf3   : > { %625 = vmatmul.mubr.f32.gmra.mxu0 %v380_v54  ;;  %721 = vmatmul.mubr.f32.gmra.mxu1 %v412_v55 }
  0xf4   : > { %630 = vmatprep.mubr.f32.mxu0 %v383_v56  ;;  %726 = vmatprep.mubr.f32.mxu1 %v415_v57 }
  0xf7   : > { %631 = vmatmul.mubr.f32.gmra.mxu0 %v382_v58  ;;  %727 = vmatmul.mubr.f32.gmra.mxu1 %v414_v59 }
  0xf8   : > { %636 = vmatprep.mubr.f32.mxu0 %v385_v60  ;;  %732 = vmatprep.mubr.f32.mxu1 %v417_v61 }
  0xfb   : > { %637 = vmatmul.mubr.f32.gmra.mxu0 %v384_v62  ;;  %733 = vmatmul.mubr.f32.gmra.mxu1 %v416_v63 }
 0x17f   : > { %v548_v0 = vpop.f32.mrf.mxu0  ;;  %v644_v1 = vpop.f32.mrf.mxu1 }
 0x180   : > { %934 = vst [vmem:[%s1651_s17] sm:$0xff] %v548_v0  ;;  %966 = vst [vmem:[%s1651_s17 + $0x100] sm:$0xff] %v644_v1 }
 0x181   : > { %v550_v2 = vpop.f32.mrf.mxu0  ;;  %v646_v3 = vpop.f32.mrf.mxu1 }
 0x182   : > { %935 = vst [vmem:[%s1651_s17 + $0x8] sm:$0xff] %v550_v2  ;;  %967 = vst [vmem:[%s1651_s17 + $0x108] sm:$0xff] %v646_v3 }
 0x183   : > { %v554_v4 = vpop.f32.mrf.mxu0  ;;  %v650_v5 = vpop.f32.mrf.mxu1 }
 0x184   : > { %936 = vst [vmem:[%s1651_s17 + $0x10] sm:$0xff] %v554_v4  ;;  %968 = vst [vmem:[%s1651_s17 + $0x110] sm:$0xff] %v650_v5 }
 0x185   : > { %v556_v6 = vpop.f32.mrf.mxu0  ;;  %v652_v7 = vpop.f32.mrf.mxu1 }
 0x186   : > { %937 = vst [vmem:[%s1651_s17 + $0x18] sm:$0xff] %v556_v6  ;;  %969 = vst [vmem:[%s1651_s17 + $0x118] sm:$0xff] %v652_v7 }
 0x187   : > { %v560_v8 = vpop.f32.mrf.mxu0  ;;  %v656_v9 = vpop.f32.mrf.mxu1 }
 0x188   : > { %938 = vst [vmem:[%s1651_s17 + $0x20] sm:$0xff] %v560_v8  ;;  %970 = vst [vmem:[%s1651_s17 + $0x120] sm:$0xff] %v656_v9 }
 0x189   : > { %v562_v10 = vpop.f32.mrf.mxu0  ;;  %v658_v11 = vpop.f32.mrf.mxu1 }
 0x18a   : > { %939 = vst [vmem:[%s1651_s17 + $0x28] sm:$0xff] %v562_v10  ;;  %971 = vst [vmem:[%s1651_s17 + $0x128] sm:$0xff] %v658_v11 }
 0x18b   : > { %v566_v12 = vpop.f32.mrf.mxu0  ;;  %v662_v13 = vpop.f32.mrf.mxu1 }
 0x18c   : > { %940 = vst [vmem:[%s1651_s17 + $0x30] sm:$0xff] %v566_v12  ;;  %972 = vst [vmem:[%s1651_s17 + $0x130] sm:$0xff] %v662_v13 }
 0x18d   : > { %v568_v14 = vpop.f32.mrf.mxu0  ;;  %v664_v15 = vpop.f32.mrf.mxu1 }
 0x18e   : > { %941 = vst [vmem:[%s1651_s17 + $0x38] sm:$0xff] %v568_v14  ;;  %973 = vst [vmem:[%s1651_s17 + $0x138] sm:$0xff] %v664_v15 }
 0x18f   : > { %v572_v16 = vpop.f32.mrf.mxu0  ;;  %v668_v17 = vpop.f32.mrf.mxu1 }
 0x190   : > { %942 = vst [vmem:[%s1651_s17 + $0x40] sm:$0xff] %v572_v16  ;;  %974 = vst [vmem:[%s1651_s17 + $0x140] sm:$0xff] %v668_v17 }
 0x191   : > { %v574_v18 = vpop.f32.mrf.mxu0  ;;  %v670_v19 = vpop.f32.mrf.mxu1 }
 0x192   : > { %943 = vst [vmem:[%s1651_s17 + $0x48] sm:$0xff] %v574_v18  ;;  %975 = vst [vmem:[%s1651_s17 + $0x148] sm:$0xff] %v670_v19 }
 0x193   : > { %v578_v20 = vpop.f32.mrf.mxu0  ;;  %v674_v21 = vpop.f32.mrf.mxu1 }
 0x194   : > { %944 = vst [vmem:[%s1651_s17 + $0x50] sm:$0xff] %v578_v20  ;;  %976 = vst [vmem:[%s1651_s17 + $0x150] sm:$0xff] %v674_v21 }
 0x195   : > { %v580_v22 = vpop.f32.mrf.mxu0  ;;  %v676_v23 = vpop.f32.mrf.mxu1 }
 0x196   : > { %945 = vst [vmem:[%s1651_s17 + $0x58] sm:$0xff] %v580_v22  ;;  %977 = vst [vmem:[%s1651_s17 + $0x158] sm:$0xff] %v676_v23 }
 0x197   : > { %v584_v24 = vpop.f32.mrf.mxu0  ;;  %v680_v25 = vpop.f32.mrf.mxu1 }
 0x198   : > { %946 = vst [vmem:[%s1651_s17 + $0x60] sm:$0xff] %v584_v24  ;;  %978 = vst [vmem:[%s1651_s17 + $0x160] sm:$0xff] %v680_v25 }
 0x199   : > { %v586_v26 = vpop.f32.mrf.mxu0  ;;  %v682_v27 = vpop.f32.mrf.mxu1 }
 0x19a   : > { %947 = vst [vmem:[%s1651_s17 + $0x68] sm:$0xff] %v586_v26  ;;  %979 = vst [vmem:[%s1651_s17 + $0x168] sm:$0xff] %v682_v27 }
 0x19b   : > { %v590_v28 = vpop.f32.mrf.mxu0  ;;  %v686_v29 = vpop.f32.mrf.mxu1 }
 0x19c   : > { %948 = vst [vmem:[%s1651_s17 + $0x70] sm:$0xff] %v590_v28  ;;  %980 = vst [vmem:[%s1651_s17 + $0x170] sm:$0xff] %v686_v29 }
 0x19d   : > { %v592_v30 = vpop.f32.mrf.mxu0  ;;  %v688_v31 = vpop.f32.mrf.mxu1 }
 0x19e   : > { %949 = vst [vmem:[%s1651_s17 + $0x78] sm:$0xff] %v592_v30  ;;  %981 = vst [vmem:[%s1651_s17 + $0x178] sm:$0xff] %v688_v31 }
 0x19f   : > { %v596_v32 = vpop.f32.mrf.mxu0  ;;  %v692_v33 = vpop.f32.mrf.mxu1 }
 0x1a0   : > { %950 = vst [vmem:[%s1651_s17 + $0x80] sm:$0xff] %v596_v32  ;;  %982 = vst [vmem:[%s1651_s17 + $0x180] sm:$0xff] %v692_v33 }
 0x1a1   : > { %v598_v34 = vpop.f32.mrf.mxu0  ;;  %v694_v35 = vpop.f32.mrf.mxu1 }
 0x1a2   : > { %951 = vst [vmem:[%s1651_s17 + $0x88] sm:$0xff] %v598_v34  ;;  %983 = vst [vmem:[%s1651_s17 + $0x188] sm:$0xff] %v694_v35 }
 0x1a3   : > { %v602_v36 = vpop.f32.mrf.mxu0  ;;  %v698_v37 = vpop.f32.mrf.mxu1 }
 0x1a4   : > { %952 = vst [vmem:[%s1651_s17 + $0x90] sm:$0xff] %v602_v36  ;;  %984 = vst [vmem:[%s1651_s17 + $0x190] sm:$0xff] %v698_v37 }
 0x1a5   : > { %v604_v38 = vpop.f32.mrf.mxu0  ;;  %v700_v39 = vpop.f32.mrf.mxu1 }
 0x1a6   : > { %953 = vst [vmem:[%s1651_s17 + $0x98] sm:$0xff] %v604_v38  ;;  %985 = vst [vmem:[%s1651_s17 + $0x198] sm:$0xff] %v700_v39 }
 0x1a7   : > { %v608_v40 = vpop.f32.mrf.mxu0  ;;  %v704_v41 = vpop.f32.mrf.mxu1 }
 0x1a8   : > { %954 = vst [vmem:[%s1651_s17 + $0xa0] sm:$0xff] %v608_v40  ;;  %986 = vst [vmem:[%s1651_s17 + $0x1a0] sm:$0xff] %v704_v41 }
 0x1a9   : > { %v610_v42 = vpop.f32.mrf.mxu0  ;;  %v706_v43 = vpop.f32.mrf.mxu1 }
 0x1aa   : > { %955 = vst [vmem:[%s1651_s17 + $0xa8] sm:$0xff] %v610_v42  ;;  %987 = vst [vmem:[%s1651_s17 + $0x1a8] sm:$0xff] %v706_v43 }
 0x1ab   : > { %v614_v44 = vpop.f32.mrf.mxu0  ;;  %v710_v45 = vpop.f32.mrf.mxu1 }
 0x1ac   : > { %956 = vst [vmem:[%s1651_s17 + $0xb0] sm:$0xff] %v614_v44  ;;  %988 = vst [vmem:[%s1651_s17 + $0x1b0] sm:$0xff] %v710_v45 }
 0x1ad   : > { %v616_v46 = vpop.f32.mrf.mxu0  ;;  %v712_v47 = vpop.f32.mrf.mxu1 }
 0x1ae   : > { %957 = vst [vmem:[%s1651_s17 + $0xb8] sm:$0xff] %v616_v46  ;;  %989 = vst [vmem:[%s1651_s17 + $0x1b8] sm:$0xff] %v712_v47 }
 0x1af   : > { %v620_v48 = vpop.f32.mrf.mxu0  ;;  %v716_v49 = vpop.f32.mrf.mxu1 }
 0x1b0   : > { %958 = vst [vmem:[%s1651_s17 + $0xc0] sm:$0xff] %v620_v48  ;;  %990 = vst [vmem:[%s1651_s17 + $0x1c0] sm:$0xff] %v716_v49 }
 0x1b1   : > { %v622_v50 = vpop.f32.mrf.mxu0  ;;  %v718_v51 = vpop.f32.mrf.mxu1 }
 0x1b2   : > { %959 = vst [vmem:[%s1651_s17 + $0xc8] sm:$0xff] %v622_v50  ;;  %991 = vst [vmem:[%s1651_s17 + $0x1c8] sm:$0xff] %v718_v51 }
 0x1b3   : > { %v626_v52 = vpop.f32.mrf.mxu0  ;;  %v722_v53 = vpop.f32.mrf.mxu1 }
 0x1b4   : > { %960 = vst [vmem:[%s1651_s17 + $0xd0] sm:$0xff] %v626_v52  ;;  %992 = vst [vmem:[%s1651_s17 + $0x1d0] sm:$0xff] %v722_v53 }
 0x1b5   : > { %v628_v54 = vpop.f32.mrf.mxu0  ;;  %v724_v55 = vpop.f32.mrf.mxu1 }
 0x1b6   : > { %961 = vst [vmem:[%s1651_s17 + $0xd8] sm:$0xff] %v628_v54  ;;  %993 = vst [vmem:[%s1651_s17 + $0x1d8] sm:$0xff] %v724_v55 }
 0x1b7   : > { %v632_v56 = vpop.f32.mrf.mxu0  ;;  %v728_v57 = vpop.f32.mrf.mxu1 }
 0x1b8   : > { %962 = vst [vmem:[%s1651_s17 + $0xe0] sm:$0xff] %v632_v56  ;;  %994 = vst [vmem:[%s1651_s17 + $0x1e0] sm:$0xff] %v728_v57 }
 0x1b9   : > { %v634_v58 = vpop.f32.mrf.mxu0  ;;  %v730_v59 = vpop.f32.mrf.mxu1 }
 0x1ba   : > { %963 = vst [vmem:[%s1651_s17 + $0xe8] sm:$0xff] %v634_v58  ;;  %995 = vst [vmem:[%s1651_s17 + $0x1e8] sm:$0xff] %v730_v59 }
 0x1bb   : > { %v638_v60 = vpop.f32.mrf.mxu0  ;;  %v734_v61 = vpop.f32.mrf.mxu1 }
 0x1bc   : > { %964 = vst [vmem:[%s1651_s17 + $0xf0] sm:$0xff] %v638_v60  ;;  %996 = vst [vmem:[%s1651_s17 + $0x1f0] sm:$0xff] %v734_v61 }
 0x1bd   : > { %v640_v62 = vpop.f32.mrf.mxu0  ;;  %v736_v63 = vpop.f32.mrf.mxu1 }
 0x1be   : > { %965 = vst [vmem:[%s1651_s17 + $0xf8] sm:$0xff] %v640_v62  ;;  %997 = vst [vmem:[%s1651_s17 + $0x1f8] sm:$0xff] %v736_v63 }
 0x1bf   : > { %1352 = shalt.err (!%p1349_p5)
}
 0x1c0   : > { %s1353_s6 = scalar_lea.hbm %s1718_s24, 8192  ;;  %s1357_s4 = scalar_lea.hbm %s1774_s2, 16384 }
 0x1c1   : > { %p1354_p7 = scmp.ne.s32.totalorder %s1718_s24, %s1353_s6  ;;  %p1358_p9 = scmp.lt.s32.totalorder %s1718_s24, %s1774_s2 }
 0x1c2   : > { %p1359_p11 = scmp.lt.s32.totalorder %s1357_s4, %s1353_s6 }
 0x1c3   : > { %p1355_p4 = pnand %p1354_p7, %p1538_p13 }
 0x1c4   : > { %p1360_p10 = por %p1359_p11, %p1358_p9 }
 0x1c5   : > { %p1356_p6 = pneg %p1355_p4 }
 0x1c7   : > { %p1361_p1 = pnand %p1360_p10, %p1356_p6 }
 0x1c9   : > { %1364 = shalt.err (!%p1361_p1)
}
 0x1ca   : > { %s1430_s28 = smov 256   ;;  %s1431_s17 = smov 512  }
 0x1cb   : > { %s1432_s19 = smov 16  }
 0x1cc   : > { %1213 = dma.vmem_to_hbm [thread:$0]  (%p1538_p13), %s1720_s21, 8192, %s1718_s24, %s999_s12, %s1430_s28, %s1431_s17, %s1432_s19  }
 0x1cd PF: > { %s1030_s22 = sand.u32 1, %s1403_s9   ;;  %p1788_p8 = scmp.ne.s32.totalorder %s1780_s20, 0 }
 0x1ce   : > { %p1789_p12 = scmp.ge.s32.totalorder %s1423_s14, 2  ;;  %s1031_s23 = scalar_lea.sflag [#allocation5], %s1030_s22 }
 0x1d0   : > { %p1224_p0 = pnand %p1789_p12, %p1788_p8 }
 0x1d2   : > { %p1225_p2 = pneg %p1224_p0 }
 0x1d4   : > { %1398 = dma.done.wait (%p1225_p2), %s1031_s23, 8192  }
 0x1d5   : > { %1400 = vsyncadd (%p1225_p2), %s1031_s23, 4294959104  ;;  %s19_s14 = sadd.s32 1, %s1423_s14   ;;  %s1790_s9 = smov %s1407_s10 }
 0x1d6   : > { %p16_p3 = scmp.ge.s32.totalorder %s19_s14, 4   ;;  %s1791_s10 = smov %s1411_s11 }
 0x1d7   : > { %s1792_s11 = smov %s1547_s15  ;;  %s1793_s12 = smov %s1419_s13 }
 0x1d8   : > { %s1794_s13 = smov %s1796_s25  ;;  %18 = sbr.rel (!%p16_p3) target bundleno = 7 (0x7), region = 87 }
 0x1dd   :  { %1036 = vsyncpa [#allocation4], 1 }
 0x1de   :  { %1038 = vsyncpa [#allocation4 + $0x1], 1 }
 0x1df   :  { %1039 = vsyncpa [#allocation7], 1 }
 0x1e0   :  { %1041 = vsyncpa [#allocation7 + $0x1], 1 }
 0x1e1   :  { %1042 = vsyncpa [#allocation5], 1 }
 0x1e2   :  { %1044 = vsyncpa [#allocation5 + $0x1], 1 }

</bundles_post_ra>
